<compile_context>
chip_gen: v6e
topology: v6e:2x2x1
jax: 0.10.0
libtpu: 0.0.40
codegen_flags: <defaults>
</compile_context>

<pallas_src>
import math
from functools import partial

import jax
import jax.numpy as jnp
from jax.experimental import pallas as pl
from jax.experimental.pallas import tpu as pltpu

_LANES = 128
_SUBLANES = 8


def _round_up(x, m):
    return ((x + m - 1) // m) * m


def mlp_kernel(x_ref, w_ref, b_ref, o_ref, *, o_size):
    x = x_ref[...]          # (bn, i_size)   f32
    w = w_ref[...]          # (i_size, o_pad) f32, VMEM-resident across grid steps
    b = b_ref[...]          # (1, o_pad)     f32, padded cols hold -1e30

    i_size = w_ref.shape[0]
    # Tiny contraction (K = 2): unrolled VPU broadcast-FMAs, skip the MXU.
    logits = b + x[:, 0:1] * w[0:1, :]
    for k in range(1, i_size):
        logits = logits + x[:, k : k + 1] * w[k : k + 1, :]

    # Numerically stable softmax over the (padded) lane dim. Padded columns
    # carry a -1e30 bias, so exp underflows to exactly 0 and contributes
    # nothing to the denominator.
    m = jnp.max(logits, axis=-1, keepdims=True)
    e = jnp.exp(logits - m)
    denom = jnp.sum(e, axis=-1, keepdims=True)
    probs = e / denom                       # exact divide: rows sum to 1

    # Compact store: only the real o_size columns go back to HBM.
    o_ref[...] = probs[:, :o_size].astype(o_ref.dtype)


def make_mlp_forward(w, b, *, block_n=2048):
    """Build a jitted forward(x) for softmax(x @ w + b).

    w: (i_size, o_size), b: (o_size,). Padding of w/b to 128 lanes is done
    once here, not per call.
    """
    i_size, o_size = w.shape
    o_pad = _round_up(o_size, _LANES)

    w_p = jnp.zeros((i_size, o_pad), jnp.float32).at[:, :o_size].set(w.astype(jnp.float32))
    b_p = jnp.full((1, o_pad), -1e30, dtype=jnp.float32).at[0, :o_size].set(b.astype(jnp.float32))

    @jax.jit
    def forward(x):
        n = x.shape[0]
        # Cap the tile so the grid has >= 2 steps for large n (v7x megacore),
        # and keep the sublane dim a multiple of 8.
        bn = min(block_n, _round_up(pl.cdiv(n, 2), _SUBLANES))
        bn = max(_round_up(bn, _SUBLANES), _SUBLANES)
        grid = (pl.cdiv(n, bn),)

        return pl.pallas_call(
            partial(mlp_kernel, o_size=o_size),
            out_shape=jax.ShapeDtypeStruct((n, o_size), jnp.float32),
            grid=grid,
            in_specs=[
                pl.BlockSpec((bn, i_size), lambda i: (i, 0)),      # streamed per tile
                pl.BlockSpec((i_size, o_pad), lambda i: (0, 0)),   # resident weights
                pl.BlockSpec((1, o_pad), lambda i: (0, 0)),        # resident bias
            ],
            out_specs=pl.BlockSpec((bn, o_size), lambda i: (i, 0)),  # compact output
            compiler_params=pltpu.CompilerParams(
                dimension_semantics=("parallel",),  # megacore-shard batch tiles
            ),
        )(x, w_p, b_p)

    return forward


if __name__ == "__main__":
    i_size = 2
    o_size = 10
    batch = 8

    key = jax.random.PRNGKey(0)
    kx, kw, kb = jax.random.split(key, 3)

    # Deterministic init mimicking nn.Linear's default uniform(-1/sqrt(in), 1/sqrt(in)).
    bound = 1.0 / math.sqrt(i_size)
    w = jax.random.uniform(kw, (i_size, o_size), jnp.float32, -bound, bound)
    b = jax.random.uniform(kb, (o_size,), jnp.float32, -bound, bound)
    x = jax.random.normal(kx, (batch, i_size), jnp.float32)

    mlp_forward = make_mlp_forward(w, b)
    out = jax.block_until_ready(mlp_forward(x))

    # Reference check in plain JAX.
    ref = jax.nn.softmax(x @ w + b, axis=-1)
    assert out.shape == (batch, o_size)
    assert jnp.allclose(out, ref, atol=1e-5, rtol=1e-5)
    assert jnp.allclose(jnp.sum(out, axis=-1), jnp.ones((batch,)), atol=1e-5)

    # Exercise the multi-tile grid + ragged-last-tile path with a bigger,
    # non-tile-multiple batch (no explicit padding anywhere).
    mlp_forward_small_tiles = make_mlp_forward(w, b, block_n=256)
    x2 = jax.random.normal(kx, (1000, i_size), jnp.float32)
    out2 = jax.block_until_ready(mlp_forward_small_tiles(x2))
    ref2 = jax.nn.softmax(x2 @ w + b, axis=-1)
    assert out2.shape == (1000, o_size)
    assert jnp.allclose(out2, ref2, atol=1e-5, rtol=1e-5)
    assert jnp.allclose(jnp.sum(out2, axis=-1), jnp.ones((1000,)), atol=1e-5)

    print("KERNEL_OK")
</pallas_src>

<mosaic_0001>
module attributes {stable_mosaic.version = 11 : i64} {
  func.func @mlp_kernel(%arg0: i32, %arg1: memref<8x2xf32, #tpu.memory_space<vmem>>, %arg2: memref<2x128xf32, #tpu.memory_space<vmem>>, %arg3: memref<1x128xf32, #tpu.memory_space<vmem>>, %arg4: memref<8x10xf32, #tpu.memory_space<vmem>>) attributes {dimension_semantics = [#tpu.dimension_semantics<parallel>], iteration_bounds = array<i64: 1>, scalar_prefetch = 0 : i64, scratch_operands = 0 : i64, tpu.core_type = #tpu.core_type<tc>, window_params = [{transform_indices = @transform_0, window_bounds = array<i64: 8, 2>}, {pipeline_mode = #tpu.pipeline_mode<synchronous>, transform_indices = @transform_1, window_bounds = array<i64: 2, 128>}, {pipeline_mode = #tpu.pipeline_mode<synchronous>, transform_indices = @transform_2, window_bounds = array<i64: 1, 128>}, {transform_indices = @transform_3, window_bounds = array<i64: 8, 10>}]} {
    %c0 = arith.constant 0 : index
    %c0_0 = arith.constant 0 : index
    %0 = vector.load %arg1[%c0, %c0_0] : memref<8x2xf32, #tpu.memory_space<vmem>>, vector<8x2xf32>
    %c0_1 = arith.constant 0 : index
    %c0_2 = arith.constant 0 : index
    %1 = vector.load %arg2[%c0_1, %c0_2] : memref<2x128xf32, #tpu.memory_space<vmem>>, vector<2x128xf32>
    %c0_3 = arith.constant 0 : index
    %c0_4 = arith.constant 0 : index
    %2 = vector.load %arg3[%c0_3, %c0_4] : memref<1x128xf32, #tpu.memory_space<vmem>>, vector<1x128xf32>
    %3 = vector.extract_strided_slice %0 {offsets = [0, 0], sizes = [8, 1], strides = [1, 1]} : vector<8x2xf32> to vector<8x1xf32>
    %4 = vector.extract_strided_slice %1 {offsets = [0, 0], sizes = [1, 128], strides = [1, 1]} : vector<2x128xf32> to vector<1x128xf32>
    %5 = vector.broadcast %3 : vector<8x1xf32> to vector<8x128xf32>
    %6 = vector.broadcast %4 : vector<1x128xf32> to vector<8x128xf32>
    %7 = arith.mulf %5, %6 : vector<8x128xf32>
    %8 = vector.broadcast %2 : vector<1x128xf32> to vector<8x128xf32>
    %9 = arith.addf %8, %7 : vector<8x128xf32>
    %10 = vector.extract_strided_slice %0 {offsets = [0, 1], sizes = [8, 1], strides = [1, 1]} : vector<8x2xf32> to vector<8x1xf32>
    %11 = vector.extract_strided_slice %1 {offsets = [1, 0], sizes = [1, 128], strides = [1, 1]} : vector<2x128xf32> to vector<1x128xf32>
    %12 = vector.broadcast %10 : vector<8x1xf32> to vector<8x128xf32>
    %13 = vector.broadcast %11 : vector<1x128xf32> to vector<8x128xf32>
    %14 = arith.mulf %12, %13 : vector<8x128xf32>
    %15 = arith.addf %9, %14 : vector<8x128xf32>
    %cst = arith.constant dense<0xFF800000> : vector<8xf32>
    %16 = vector.multi_reduction <maximumf>, %15, %cst [1] : vector<8x128xf32> to vector<8xf32>
    %17 = vector.shape_cast %16 : vector<8xf32> to vector<8x1xf32>
    %18 = vector.broadcast %17 : vector<8x1xf32> to vector<8x128xf32>
    %19 = arith.subf %15, %18 : vector<8x128xf32>
    %20 = math.exp %19 : vector<8x128xf32>
    %cst_5 = arith.constant dense<0.000000e+00> : vector<8xf32>
    %21 = vector.multi_reduction <add>, %20, %cst_5 [1] : vector<8x128xf32> to vector<8xf32>
    %22 = vector.shape_cast %21 : vector<8xf32> to vector<8x1xf32>
    %23 = vector.broadcast %22 : vector<8x1xf32> to vector<8x128xf32>
    %24 = arith.divf %20, %23 : vector<8x128xf32>
    %25 = vector.extract_strided_slice %24 {offsets = [0, 0], sizes = [8, 10], strides = [1, 1]} : vector<8x128xf32> to vector<8x10xf32>
    %c0_6 = arith.constant 0 : index
    %c0_7 = arith.constant 0 : index
    %26 = vector.load %arg4[%c0_6, %c0_7] : memref<8x10xf32, #tpu.memory_space<vmem>>, vector<8x10xf32>
    tpu.vector_store %arg4[%c0_6, %c0_7], %25 {strides = array<i32>} : memref<8x10xf32, #tpu.memory_space<vmem>>, vector<8x10xf32>,
    return
  }
  func.func @transform_0(%arg0: i32) -> (i32, i32) {
    %c0_i32 = arith.constant 0 : i32
    %c0_i32_0 = arith.constant 0 : i32
    return %arg0, %c0_i32 : i32, i32
  }
  func.func @transform_1(%arg0: i32) -> (i32, i32) {
    %c0_i32 = arith.constant 0 : i32
    %c0_i32_0 = arith.constant 0 : i32
    %c0_i32_1 = arith.constant 0 : i32
    return %c0_i32, %c0_i32_0 : i32, i32
  }
  func.func @transform_2(%arg0: i32) -> (i32, i32) {
    %c0_i32 = arith.constant 0 : i32
    %c0_i32_0 = arith.constant 0 : i32
    %c0_i32_1 = arith.constant 0 : i32
    return %c0_i32, %c0_i32_0 : i32, i32
  }
  func.func @transform_3(%arg0: i32) -> (i32, i32) {
    %c0_i32 = arith.constant 0 : i32
    %c0_i32_0 = arith.constant 0 : i32
    return %arg0, %c0_i32 : i32, i32
  }
}

</mosaic_0001>

<bundles_post_ra>
// kernel: forward.1
= control target key start
LH: loop header
LB: loop body
LE: loop exit
PB: predicated region body
PF: predicated region fallthrough
CT: control target
= control target key end

     0   :  { %v102_v1 = vmov 0   ;;  %s137_s0 = inlined_call_operand.vmem [shape: f32[8,2], index: 0, kind: input, shape index: {}]   ;;  %s138_s1 = inlined_call_operand.vmem [shape: f32[2,128], index: 1, kind: input, shape index: {}]   ;;  %s139_s2 = inlined_call_operand.vmem [shape: f32[1,128], index: 2, kind: input, shape index: {}]   ;;  %s140_s3 = inlined_call_operand.hbm [shape: f32[8,10], index: 3, kind: output, shape index: {}]  }
   0x1   :  { %v15_v0 = vld [vmem:[%s137_s0] sm:$0xff]  ;;  %74 = vset.pattern.permute.xlu0 %v102_v1 }
   0x2   :  { %8 = vsyncpa [#allocation3], 0  ;;  %20 = vperm.xlu0 %74, %v15_v0   ;;  %v103_v2 = vmov 1   ;;  %v23_v3 = vlaneseq  ;;  %v16_v6 = vld [vmem:[%s138_s1] sm:$0x3]  ;;  %s104_s1 = smov [#allocation2]  }
   0x3   :  { %v70_v12 = vld [vmem:[%s139_s2] ss:$0 sm:$0xff]  ;;  %s62_s17 = sshll.u32 %s104_s1, 4  ;;  %vm54_vm0 = vcmask 80896   ;;  %s63_s17 = int_to_ptr.vmem [resolvable:$true] %s62_s17 }
   0x4   :  { %v24_v4 = vshrl.u32 %v23_v3, 7  ;;  %s80_s2 = scalar_lea.vmem %s63_s17, 128  ;;  %p85_p1 = scmp.lt.s32.totalorder %s63_s17, %s63_s17 }
   0x5   :  { %p81_p0 = scmp.ne.s32.totalorder %s63_s17, %s80_s2  ;;  %p86_p2 = scmp.lt.s32.totalorder %s80_s2, %s80_s2 }
   0x6   :  { %75 = vset.pattern.permute.xlu0 %v103_v2  ;;  %v25_v5 = vsub.s32 0, %v24_v4  ;;  %v41_v8 = vsub.s32 1, %v24_v4 }
   0x7   :  { %36 = vperm.xlu0 %75, %v15_v0   ;;  %p87_p3 = por %p86_p2, %p85_p1 }
   0x8   :  { %v26_v7 = vrot.slane %v16_v6, %v25_v5  ;;  %v42_v11 = vrot.slane %v16_v6, %v41_v8 }
   0x9   :  { %p88_p4 = pnand %p87_p3, %p81_p0 }
  0x7d   :  { %v21_v9 = vpop.permute.xlu0 %20 }
  0x7e   :  { %v27_v10 = vmul.f32 %v26_v7, %v21_v9 }
  0x80   :  { %v34_v14 = vadd.f32 %v70_v12, %v27_v10 }
  0x82   :  { %v37_v13 = vpop.permute.xlu0 %36 }
  0x83   :  { %v43_v15 = vmul.f32 %v42_v11, %v37_v13 }
  0x85   :  { %v44_v16 = vadd.f32 %v43_v15, %v34_v14 }
  0x87   :  { %45 = vmax.xlane.f32.xlu1 %v44_v16 }
 0x110   :  { %v46_v17 = vpop.xlane.xlu1 %45 }
 0x111   :  { %v47_v18 = vsub.f32 %v44_v16, %v46_v17 }
 0x113   :  { %v48_v19 = vmul.f32 1.442695, %v47_v18 }
 0x115   :  { %76 = vpow2.f32 %v48_v19 }
 0x122   :  { %v77_v20 = vpop.eup %76 }
 0x123   :  { %50 = vadd.xlane.f32.xlu1 %v77_v20 }
 0x1ac   :  { %v51_v21 = vpop.xlane.xlu1 %50 }
 0x1ad   :  { %78 = vrcp.f32 %v51_v21 }
 0x1ba   :  { %v79_v22 = vpop.eup %78 }
 0x1bb   :  { %v53_v23 = vmul.f32 %v79_v22, %v77_v20 }
 0x1bd   :  { %55 = vst.msk [vmem:[#allocation2] sm:$0xff] %vm54_vm0, %v53_v23 }
 0x1be   :  { %91 = shalt.err (!%p88_p4)
}
 0x1bf   :  { %65 = dma.vmem_to_hbm [thread:$0]  %s63_s17, 128, %s140_s3, [#allocation3]  }
 0x1c0   :  { %100 = dma.done.wait [#allocation3], 128  }
 0x1c1   :  { %101 = vsyncadd [#allocation3], 4294967168 }
 0x1c2   :  { %69 = vsyncpa [#allocation3], 1 }

</bundles_post_ra>
